<compile_context>
chip_gen: v6e
topology: v6e:2x2x1
jax: 0.10.0
libtpu: 0.0.40
codegen_flags: <defaults>
</compile_context>

<pallas_src>
import jax
import jax.numpy as jnp
from jax.experimental import pallas as pl
from jax.experimental.pallas import tpu as pltpu


def _cdiv(a, b):
    return -(-a // b)


def _linear_kernel(x_ref, w_ref, b_ref, o_ref):
    # x_ref: (TM, IN), w_ref: (OUT_PAD, IN), b_ref: (OUT_PAD, 1), o_ref: (OUT_PAD, TM)
    # Contract on the shared IN axis of both operands -> no transpose needed.
    acc = jax.lax.dot_general(
        w_ref[...],
        x_ref[...],
        dimension_numbers=(((1,), (1,)), ((), ())),
        preferred_element_type=jnp.float32,
    )
    o_ref[...] = (acc + b_ref[...]).astype(o_ref.dtype)


def prepare_mtl_fc_params(weight, bias):
    """Pad OUT up to the 8-sublane granule ONCE (cache the result; do not
    rebuild per forward call)."""
    out_features, in_features = weight.shape
    out_pad = max(8, _cdiv(out_features, 8) * 8)
    w_pad = jnp.zeros((out_pad, in_features), weight.dtype).at[:out_features, :].set(weight)
    b_pad = jnp.zeros((out_pad, 1), bias.dtype).at[:out_features, 0].set(bias)
    return w_pad, b_pad


def mtl_fc_forward(x, weight, bias, p, *, padded_params=None, min_pallas_batch=256):
    """Pallas implementation of mtl_fc.forward: returns (Linear(x), p)."""
    B, IN = x.shape
    OUT, IN_w = weight.shape
    assert IN == IN_w

    # Tiny-batch / GEMV regime (the module's stated production shape, B=8):
    # a pallas_call is pure launch + DMA overhead here; let XLA fuse it.
    if B < min_pallas_batch:
        return x @ weight.T + bias, p

    if padded_params is None:
        # Prefer precomputing at parameter-init time and passing padded_params.
        padded_params = prepare_mtl_fc_params(weight, bias)
    w_pad, b_pad = padded_params
    # Make dtype promotion explicit (no-op when dtypes already match).
    w_pad = w_pad.astype(x.dtype)
    b_pad = b_pad.astype(x.dtype)
    out_pad = w_pad.shape[0]

    # ---- batch tile selection -------------------------------------------
    # Output is (out_pad, B_pad) with batch along the 128-lane axis, so TM must
    # be a multiple of 128 when there is more than one tile.
    n128 = _cdiv(B, 128)                 # 128-row granules needed
    min_tiles = 2 if n128 >= 2 else 1    # let v7x's 2nd TensorCore get work
    tm_g = min(8, max(1, n128 // min_tiles))  # cap TM at 8*128 = 1024 rows
    # Shrink the tile when it strictly reduces batch padding (keep waste to the
    # unavoidable round-up to 128 rows).
    best = tm_g
    for t in range(tm_g, 0, -1):
        if _cdiv(n128, t) * t < _cdiv(n128, best) * best:
            best = t
    tm_g = best
    TM = tm_g * 128
    n_tiles = _cdiv(n128, tm_g)
    B_pad = n_tiles * TM

    if B_pad == B:
        x_pad = x
    else:
        x_pad = jnp.zeros((B_pad, IN), x.dtype).at[:B, :].set(x)

    yT_pad = pl.pallas_call(
        _linear_kernel,
        out_shape=jax.ShapeDtypeStruct((out_pad, B_pad), x.dtype),
        grid=(n_tiles,),
        in_specs=[
            # x: tiled over the batch grid.
            pl.BlockSpec((TM, IN), lambda i: (i, 0)),
            # weight / bias: grid-invariant, whole-array resident in VMEM.
            pl.BlockSpec(memory_space=pltpu.MemorySpace.VMEM),
            pl.BlockSpec(memory_space=pltpu.MemorySpace.VMEM),
        ],
        # Output (OUT_PAD, B_pad): batch on the lane axis -> unmasked vst.
        out_specs=pl.BlockSpec((out_pad, TM), lambda i: (0, i)),
        compiler_params=pltpu.CompilerParams(
            dimension_semantics=("parallel",),  # shard batch tiles across v7x's 2 TCs
        ),
    )(x_pad, w_pad, b_pad)

    # Strip padding and restore (B, OUT) orientation outside the kernel
    # (tiny (OUT, B) slab, cheap).
    y = yT_pad[:OUT, :B].T

    # The learnable parameter `p` is simply returned alongside the output,
    # matching the PyTorch module (no compute applied to it).
    return y, p


if __name__ == "__main__":
    # Shapes consistent with the module (nn.Linear over the last dim).
    in_features = 512   # module default
    out_features = 2
    nb_adparams = 4

    key = jax.random.PRNGKey(0)
    kx1, kx2, kw, kb = jax.random.split(key, 4)

    bound = 1.0 / (in_features ** 0.5)
    weight = jax.random.uniform(
        kw, (out_features, in_features), minval=-bound, maxval=bound,
        dtype=jnp.float32,
    )
    bias = jax.random.uniform(
        kb, (out_features,), minval=-bound, maxval=bound, dtype=jnp.float32
    )
    p = jnp.ones((nb_adparams,), dtype=jnp.float32)  # torch.ones(nb_adparams)

    # Pad the parameters ONCE, outside the per-call path.
    padded = prepare_mtl_fc_params(weight, bias)

    # 1) Production shape (batch=8): small-batch dispatch -> plain fused GEMV.
    x_small = jax.random.normal(kx1, (8, in_features), dtype=jnp.float32)
    y_small, p_out = mtl_fc_forward(x_small, weight, bias, p, padded_params=padded)

    # 2) Same small batch forced through the Pallas kernel (kernel correctness).
    y_small_pk, _ = mtl_fc_forward(
        x_small, weight, bias, p, padded_params=padded, min_pallas_batch=0
    )

    # 3) Larger ragged batch -> multi-tile Pallas path (>=2 parallel tiles).
    x_big = jax.random.normal(kx2, (264, in_features), dtype=jnp.float32)
    y_big, p_out2 = mtl_fc_forward(x_big, weight, bias, p, padded_params=padded)

    jax.block_until_ready((y_small, y_small_pk, y_big, p_out, p_out2))

    # Cross-check against plain JAX reference.
    ref_small = x_small @ weight.T + bias
    ref_big = x_big @ weight.T + bias
    assert y_small.shape == (8, out_features)
    assert y_small_pk.shape == (8, out_features)
    assert y_big.shape == (264, out_features)
    assert p_out.shape == (nb_adparams,)
    assert jnp.allclose(y_small, ref_small, atol=1e-4, rtol=1e-5)
    assert jnp.allclose(y_small_pk, ref_small, atol=1e-4, rtol=1e-5)
    assert jnp.allclose(y_big, ref_big, atol=1e-4, rtol=1e-5)
    assert jnp.allclose(p_out, jnp.ones((nb_adparams,)))
    assert jnp.allclose(p_out2, jnp.ones((nb_adparams,)))

    print("KERNEL_OK")
</pallas_src>

<mosaic_0001>
module attributes {stable_mosaic.version = 11 : i64} {
  func.func @_linear_kernel(%arg0: i32, %arg1: memref<128x512xf32, #tpu.memory_space<vmem>>, %arg2: memref<8x512xf32, #tpu.memory_space<vmem>>, %arg3: memref<8x1xf32, #tpu.memory_space<vmem>>, %arg4: memref<8x128xf32, #tpu.memory_space<vmem>>) attributes {dimension_semantics = [#tpu.dimension_semantics<parallel>], iteration_bounds = array<i64: 1>, scalar_prefetch = 0 : i64, scratch_operands = 0 : i64, tpu.core_type = #tpu.core_type<tc>, window_params = [{transform_indices = @transform_0, window_bounds = array<i64: 128, 512>}, {pipeline_mode = #tpu.pipeline_mode<synchronous>, transform_indices = @transform_1, window_bounds = array<i64: 8, 512>}, {pipeline_mode = #tpu.pipeline_mode<synchronous>, transform_indices = @transform_2, window_bounds = array<i64: 8, 1>}, {transform_indices = @transform_3, window_bounds = array<i64: 8, 128>}]} {
    %c0 = arith.constant 0 : index
    %c0_0 = arith.constant 0 : index
    %0 = vector.load %arg2[%c0, %c0_0] : memref<8x512xf32, #tpu.memory_space<vmem>>, vector<8x512xf32>
    %c0_1 = arith.constant 0 : index
    %c0_2 = arith.constant 0 : index
    %1 = vector.load %arg1[%c0_1, %c0_2] : memref<128x512xf32, #tpu.memory_space<vmem>>, vector<128x512xf32>
    %cst = arith.constant dense<0.000000e+00> : vector<8x128xf32>
    %2 = tpu.matmul %0, %1, %cst {dimension_numbers = #tpu.dot_dimension_numbers<[1], [1], [0], [0], [0, 0, 1, 0], [], []>} : vector<8x512xf32>, vector<128x512xf32>, vector<8x128xf32> -> vector<8x128xf32>
    %c0_3 = arith.constant 0 : index
    %c0_4 = arith.constant 0 : index
    %3 = vector.load %arg3[%c0_3, %c0_4] : memref<8x1xf32, #tpu.memory_space<vmem>>, vector<8x1xf32>
    %4 = vector.broadcast %3 : vector<8x1xf32> to vector<8x128xf32>
    %5 = arith.addf %2, %4 : vector<8x128xf32>
    %c0_5 = arith.constant 0 : index
    %c0_6 = arith.constant 0 : index
    %6 = vector.load %arg4[%c0_5, %c0_6] : memref<8x128xf32, #tpu.memory_space<vmem>>, vector<8x128xf32>
    tpu.vector_store %arg4[%c0_5, %c0_6], %5 {strides = array<i32>} : memref<8x128xf32, #tpu.memory_space<vmem>>, vector<8x128xf32>,
    return
  }
  func.func @transform_0(%arg0: i32) -> (i32, i32) {
    %c0_i32 = arith.constant 0 : i32
    %c0_i32_0 = arith.constant 0 : i32
    return %arg0, %c0_i32 : i32, i32
  }
  func.func @transform_1(%arg0: i32) -> (i32, i32) {
    %c0_i32 = arith.constant 0 : i32
    %c0_i32_0 = arith.constant 0 : i32
    %c0_i32_1 = arith.constant 0 : i32
    return %c0_i32, %c0_i32_0 : i32, i32
  }
  func.func @transform_2(%arg0: i32) -> (i32, i32) {
    %c0_i32 = arith.constant 0 : i32
    %c0_i32_0 = arith.constant 0 : i32
    %c0_i32_1 = arith.constant 0 : i32
    return %c0_i32, %c0_i32_0 : i32, i32
  }
  func.func @transform_3(%arg0: i32) -> (i32, i32) {
    %c0_i32 = arith.constant 0 : i32
    %c0_i32_0 = arith.constant 0 : i32
    return %c0_i32, %arg0 : i32, i32
  }
}

</mosaic_0001>

<bundles_post_ra>
// kernel: tpu_custom_call.1
= control target key start
LH: loop header
LB: loop body
LE: loop exit
PB: predicated region body
PF: predicated region fallthrough
CT: control target
= control target key end

     0   :  { %8 = vsyncpa [#allocation3], 0  ;;  %s383_s0 = inlined_call_operand.hbm [shape: f32[128,512], index: 0, kind: input, shape index: {}]   ;;  %s384_s1 = inlined_call_operand.hbm [shape: f32[8,512], index: 1, kind: input, shape index: {}]   ;;  %s385_s2 = inlined_call_operand.vmem [shape: f32[8,1], index: 2, kind: input, shape index: {}]   ;;  %s386_s3 = inlined_call_operand.hbm [shape: f32[8,128], index: 3, kind: output, shape index: {}]  }
   0x1   :  { %9 = vsyncpa [#allocation6], 0 }
   0x2   :  { %10 = vsyncpa [#allocation4], 0  ;;  %s345_s12 = smov [#allocation2]  }
   0x3   :  { %s16_s13 = sshll.u32 %s345_s12, 4  ;;  %s17_s13 = int_to_ptr.vmem [resolvable:$true] %s16_s13 }
   0x4   :  { %s287_s14 = scalar_lea.vmem %s17_s13, 8192  ;;  %p292_p1 = scmp.lt.s32.totalorder %s17_s13, %s17_s13 }
   0x5   :  { %p288_p0 = scmp.ne.s32.totalorder %s17_s13, %s287_s14  ;;  %p293_p2 = scmp.lt.s32.totalorder %s287_s14, %s287_s14 }
   0x7   :  { %p294_p3 = por %p293_p2, %p292_p1 }
   0x9   :  { %p295_p4 = pnand %p294_p3, %p288_p0 }
   0xb   :  { %298 = shalt.err (!%p295_p4)
}
   0xc   :  { %s346_s15 = smov 512   ;;  %s347_s16 = smov 32  }
   0xd   :  { %22 = dma.hbm_to_vmem [thread:$0]  %s383_s0, 8192, %s17_s13, [#allocation3], %s346_s15, %s346_s15, %s347_s16  }
   0xe   :  { %s348_s19 = smov [#allocation5]  }
   0xf   :  { %s29_s20 = sshll.u32 %s348_s19, 4  ;;  %s30_s20 = int_to_ptr.vmem [resolvable:$true] %s29_s20 }
  0x10   :  { %s307_s21 = scalar_lea.vmem %s30_s20, 512  ;;  %p312_p6 = scmp.lt.s32.totalorder %s30_s20, %s30_s20 }
  0x11   :  { %p308_p5 = scmp.ne.s32.totalorder %s30_s20, %s307_s21  ;;  %p313_p7 = scmp.lt.s32.totalorder %s307_s21, %s307_s21 }
  0x13   :  { %p314_p8 = por %p313_p7, %p312_p6 }
  0x15   :  { %p315_p9 = pnand %p314_p8, %p308_p5 }
  0x17   :  { %318 = shalt.err (!%p315_p9)
}
  0x18   :  { %32 = dma.hbm_to_vmem [thread:$0]  %s384_s1, 512, %s30_s20, [#allocation6]  }
  0x19   :  { %339 = dma.done.wait [#allocation3], 8192  }
  0x1a   :  { %340 = vsyncadd [#allocation3], 4294959104 }
  0x1b   :  { %341 = dma.done.wait [#allocation6], 512  }
  0x1c   :  { %342 = vsyncadd [#allocation6], 4294966784  ;;  %v349_v0 = vmov 0   ;;  %v106_v1 = vld [vmem:[#allocation2 + $0x1e8] sm:$0xff]  ;;  %v108_v2 = vld [vmem:[#allocation2 + $0x1f8] sm:$0xff] }
  0x1d   :  { %278 = vset.pattern.permute.xlu0 %v349_v0  ;;  %v105_v3 = vld [vmem:[#allocation2 + $0x1e0] sm:$0xff]  ;;  %115 = vmatprep.subr.mxu0 %v106_v1  ;;  %v107_v4 = vld [vmem:[#allocation2 + $0x1f0] sm:$0xff]  ;;  %v102_v5 = vld [vmem:[#allocation2 + $0x1c8] sm:$0xff] }
  0x1e   :  { %185 = vmatprep.subr.mxu1 %v108_v2  ;;  %v104_v6 = vld [vmem:[#allocation2 + $0x1d8] sm:$0xff]  ;;  %116 = vmatpush1.xpose.msra.mxu0 %v105_v3  ;;  %v101_v7 = vld [vmem:[#allocation2 + $0x1c0] sm:$0xff]  ;;  %v103_v8 = vld [vmem:[#allocation2 + $0x1d0] sm:$0xff] }
  0x1f   :  { %186 = vmatpush1.xpose.msra.mxu1 %v107_v4  ;;  %117 = vmatprep.subr.mxu0 %v102_v5  ;;  %v98_v9 = vld [vmem:[#allocation2 + $0x1a8] sm:$0xff]  ;;  %v100_v10 = vld [vmem:[#allocation2 + $0x1b8] sm:$0xff]  ;;  %v97_v11 = vld [vmem:[#allocation2 + $0x1a0] sm:$0xff] }
  0x20   :  { %187 = vmatprep.subr.mxu1 %v104_v6  ;;  %v99_v12 = vld [vmem:[#allocation2 + $0x1b0] sm:$0xff]  ;;  %v94_v13 = vld [vmem:[#allocation2 + $0x188] sm:$0xff]  ;;  %v96_v14 = vld [vmem:[#allocation2 + $0x198] sm:$0xff] }
  0x21   :  { %v93_v15 = vld [vmem:[#allocation2 + $0x180] sm:$0xff]  ;;  %v95_v16 = vld [vmem:[#allocation2 + $0x190] sm:$0xff]  ;;  %v90_v17 = vld [vmem:[#allocation2 + $0x168] sm:$0xff] }
  0x22   :  { %118 = vmatpush1.xpose.msra.mxu0 %v101_v7  ;;  %v92_v18 = vld [vmem:[#allocation2 + $0x178] sm:$0xff]  ;;  %v89_v19 = vld [vmem:[#allocation2 + $0x160] sm:$0xff]  ;;  %v91_v20 = vld [vmem:[#allocation2 + $0x170] sm:$0xff] }
  0x23   :  { %188 = vmatpush1.xpose.msra.mxu1 %v103_v8  ;;  %119 = vmatprep.subr.mxu0 %v98_v9  ;;  %v86_v21 = vld [vmem:[#allocation2 + $0x148] sm:$0xff]  ;;  %v88_v22 = vld [vmem:[#allocation2 + $0x158] sm:$0xff]  ;;  %v85_v23 = vld [vmem:[#allocation2 + $0x140] sm:$0xff] }
  0x24   :  { %189 = vmatprep.subr.mxu1 %v100_v10  ;;  %v87_v24 = vld [vmem:[#allocation2 + $0x150] sm:$0xff]  ;;  %v82_v25 = vld [vmem:[#allocation2 + $0x128] sm:$0xff]  ;;  %v84_v26 = vld [vmem:[#allocation2 + $0x138] sm:$0xff] }
  0x25   :  { %v42_v27 = vld [vmem:[#allocation5 + $0x8] sm:$0xff]  ;;  %v44_v28 = vld [vmem:[#allocation5 + $0x18] sm:$0xff]  ;;  %v109_v29 = vld [vmem:[%s385_s2] sm:$0xff]  ;;  %s350_s2 = smov [#allocation7]  }
  0x26   :  { %120 = vmatpush1.xpose.msra.mxu0 %v97_v11  ;;  %v81_v30 = vld [vmem:[#allocation2 + $0x120] sm:$0xff]  ;;  %v83_v31 = vld [vmem:[#allocation2 + $0x130] sm:$0xff]  ;;  %v78_v32 = vld [vmem:[#allocation2 + $0x108] sm:$0xff]  ;;  %179 = vmatprep.mubr.f32.mxu0 %v42_v27  ;;  %s262_s24 = sshll.u32 %s350_s2, 4  ;;  %s263_s24 = int_to_ptr.vmem [resolvable:$true] %s262_s24 }
  0x27   :  { %190 = vmatpush1.xpose.msra.mxu1 %v99_v12  ;;  %121 = vmatprep.subr.mxu0 %v94_v13  ;;  %v80_v33 = vld [vmem:[#allocation2 + $0x118] sm:$0xff]  ;;  %v77_v34 = vld [vmem:[#allocation2 + $0x100] sm:$0xff]  ;;  %v79_v35 = vld [vmem:[#allocation2 + $0x110] sm:$0xff]  ;;  %s319_s25 = scalar_lea.vmem %s263_s24, 128  ;;  %p324_p11 = scmp.lt.s32.totalorder %s263_s24, %s263_s24 }
  0x28   :  { %191 = vmatprep.subr.mxu1 %v96_v14  ;;  %249 = vmatprep.mubr.f32.mxu1 %v44_v28  ;;  %v74_v36 = vld [vmem:[#allocation2 + $0xe8] sm:$0xff]  ;;  %v76_v37 = vld [vmem:[#allocation2 + $0xf8] sm:$0xff]  ;;  %v73_v38 = vld [vmem:[#allocation2 + $0xe0] sm:$0xff]  ;;  %p320_p10 = scmp.ne.s32.totalorder %s263_s24, %s319_s25  ;;  %p325_p12 = scmp.lt.s32.totalorder %s319_s25, %s319_s25 }
  0x29   :  { %112 = vperm.xlu0 %278, %v109_v29   ;;  %v75_v39 = vld [vmem:[#allocation2 + $0xf0] sm:$0xff]  ;;  %v70_v40 = vld [vmem:[#allocation2 + $0xc8] sm:$0xff]  ;;  %v72_v41 = vld [vmem:[#allocation2 + $0xd8] sm:$0xff] }
  0x2a   :  { %122 = vmatpush1.xpose.msra.mxu0 %v93_v15  ;;  %v69_v42 = vld [vmem:[#allocation2 + $0xc0] sm:$0xff]  ;;  %v71_v43 = vld [vmem:[#allocation2 + $0xd0] sm:$0xff]  ;;  %v66_v44 = vld [vmem:[#allocation2 + $0xa8] sm:$0xff]  ;;  %p326_p13 = por %p325_p12, %p324_p11 }
  0x2b   :  { %192 = vmatpush1.xpose.msra.mxu1 %v95_v16  ;;  %123 = vmatprep.subr.mxu0 %v90_v17  ;;  %v68_v45 = vld [vmem:[#allocation2 + $0xb8] sm:$0xff]  ;;  %v65_v46 = vld [vmem:[#allocation2 + $0xa0] sm:$0xff]  ;;  %v67_v47 = vld [vmem:[#allocation2 + $0xb0] sm:$0xff] }
  0x2c   :  { %193 = vmatprep.subr.mxu1 %v92_v18  ;;  %v62_v48 = vld [vmem:[#allocation2 + $0x88] sm:$0xff]  ;;  %v64_v49 = vld [vmem:[#allocation2 + $0x98] sm:$0xff]  ;;  %v61_v50 = vld [vmem:[#allocation2 + $0x80] sm:$0xff]  ;;  %p327_p0 = pnand %p326_p13, %p320_p10 }
  0x2d   :  { %v63_v51 = vld [vmem:[#allocation2 + $0x90] sm:$0xff]  ;;  %v58_v52 = vld [vmem:[#allocation2 + $0x68] sm:$0xff]  ;;  %v60_v53 = vld [vmem:[#allocation2 + $0x78] sm:$0xff] }
  0x2e   :  { %124 = vmatpush1.xpose.msra.mxu0 %v89_v19  ;;  %v57_v54 = vld [vmem:[#allocation2 + $0x60] sm:$0xff]  ;;  %v59_v55 = vld [vmem:[#allocation2 + $0x70] sm:$0xff]  ;;  %v54_v56 = vld [vmem:[#allocation2 + $0x48] sm:$0xff] }
  0x2f   :  { %194 = vmatpush1.xpose.msra.mxu1 %v91_v20  ;;  %125 = vmatprep.subr.mxu0 %v86_v21  ;;  %v56_v57 = vld [vmem:[#allocation2 + $0x58] sm:$0xff]  ;;  %v53_v58 = vld [vmem:[#allocation2 + $0x40] sm:$0xff]  ;;  %v55_v59 = vld [vmem:[#allocation2 + $0x50] sm:$0xff] }
  0x30   :  { %195 = vmatprep.subr.mxu1 %v88_v22  ;;  %v50_v60 = vld [vmem:[#allocation2 + $0x28] sm:$0xff]  ;;  %v52_v61 = vld [vmem:[#allocation2 + $0x38] sm:$0xff]  ;;  %v49_v62 = vld [vmem:[#allocation2 + $0x20] sm:$0xff] }
  0x31   :  { %v51_v63 = vld [vmem:[#allocation2 + $0x30] sm:$0xff]  ;;  %v46_v0 = vld [vmem:[#allocation2 + $0x8] sm:$0xff]  ;;  %v48_v1 = vld [vmem:[#allocation2 + $0x18] sm:$0xff] }
  0x32   :  { %126 = vmatpush1.xpose.msra.mxu0 %v85_v23  ;;  %v45_v2 = vld [vmem:[#allocation2] sm:$0xff]  ;;  %v47_v3 = vld [vmem:[#allocation2 + $0x10] sm:$0xff] }
  0x33   :  { %196 = vmatpush1.xpose.msra.mxu1 %v87_v24  ;;  %127 = vmatprep.subr.mxu0 %v82_v25  ;;  %v41_v4 = vld [vmem:[#allocation5] sm:$0xff]  ;;  %v43_v5 = vld [vmem:[#allocation5 + $0x10] sm:$0xff] }
  0x34   :  { %197 = vmatprep.subr.mxu1 %v84_v26 }
  0x36   :  { %128 = vmatpush1.xpose.msra.mxu0 %v81_v30 }
  0x37   :  { %198 = vmatpush1.xpose.msra.mxu1 %v83_v31  ;;  %129 = vmatprep.subr.mxu0 %v78_v32 }
  0x38   :  { %199 = vmatprep.subr.mxu1 %v80_v33 }
  0x3a   :  { %130 = vmatpush1.xpose.msra.mxu0 %v77_v34 }
  0x3b   :  { %200 = vmatpush1.xpose.msra.mxu1 %v79_v35  ;;  %131 = vmatprep.subr.mxu0 %v74_v36 }
  0x3c   :  { %201 = vmatprep.subr.mxu1 %v76_v37 }
  0x3e   :  { %132 = vmatpush1.xpose.msra.mxu0 %v73_v38 }
  0x3f   :  { %202 = vmatpush1.xpose.msra.mxu1 %v75_v39  ;;  %133 = vmatprep.subr.mxu0 %v70_v40 }
  0x40   :  { %203 = vmatprep.subr.mxu1 %v72_v41 }
  0x42   :  { %134 = vmatpush1.xpose.msra.mxu0 %v69_v42 }
  0x43   :  { %204 = vmatpush1.xpose.msra.mxu1 %v71_v43  ;;  %135 = vmatprep.subr.mxu0 %v66_v44 }
  0x44   :  { %205 = vmatprep.subr.mxu1 %v68_v45 }
  0x46   :  { %136 = vmatpush1.xpose.msra.mxu0 %v65_v46 }
  0x47   :  { %206 = vmatpush1.xpose.msra.mxu1 %v67_v47  ;;  %137 = vmatprep.subr.mxu0 %v62_v48 }
  0x48   :  { %207 = vmatprep.subr.mxu1 %v64_v49 }
  0x4a   :  { %138 = vmatpush1.xpose.msra.mxu0 %v61_v50 }
  0x4b   :  { %208 = vmatpush1.xpose.msra.mxu1 %v63_v51  ;;  %139 = vmatprep.subr.mxu0 %v58_v52 }
  0x4c   :  { %209 = vmatprep.subr.mxu1 %v60_v53 }
  0x4e   :  { %140 = vmatpush1.xpose.msra.mxu0 %v57_v54 }
  0x4f   :  { %210 = vmatpush1.xpose.msra.mxu1 %v59_v55  ;;  %141 = vmatprep.subr.mxu0 %v54_v56 }
  0x50   :  { %211 = vmatprep.subr.mxu1 %v56_v57 }
  0x52   :  { %142 = vmatpush1.xpose.msra.mxu0 %v53_v58 }
  0x53   :  { %212 = vmatpush1.xpose.msra.mxu1 %v55_v59  ;;  %143 = vmatprep.subr.mxu0 %v50_v60 }
  0x54   :  { %213 = vmatprep.subr.mxu1 %v52_v61 }
  0x56   :  { %144 = vmatpush1.xpose.msra.mxu0 %v49_v62 }
  0x57   :  { %214 = vmatpush1.xpose.msra.mxu1 %v51_v63  ;;  %145 = vmatprep.subr.mxu0 %v46_v0 }
  0x58   :  { %215 = vmatprep.subr.mxu1 %v48_v1 }
  0x5a   :  { %146 = vmatpush1.xpose.msra.mxu0 %v45_v2 }
  0x5b   :  { %216 = vmatpush1.xpose.msra.mxu1 %v47_v3 }
  0x5d   :  { %180 = vmatmul.mubr.f32.vlgmr.msra.gmra.mxu0 %v41_v4 }
  0x5e   :  { %250 = vmatmul.mubr.f32.vlgmr.msra.gmra.mxu1 %v43_v5 }
  0xa4   :  { %v113_v6 = vpop.permute.xlu0 %112 }
 0x11d   :  { %v181_v7 = vpop.f32.mrf.mxu0 }
 0x11e   :  { %v251_v8 = vpop.f32.mrf.mxu1  ;;  %v182_v9 = vadd.f32 %v181_v7, %v113_v6 }
 0x11f   :  { %v183_v10 = vpop.f32.mrf.mxu0 }
 0x120   :  { %v253_v11 = vpop.f32.mrf.mxu1  ;;  %v252_v12 = vadd.f32 %v251_v8, %v182_v9 }
 0x122   :  { %255 = vst [vmem:[#allocation7] sm:$0xff] %v252_v12 }
 0x123   :  { %330 = shalt.err (!%p327_p0)
}
 0x124   :  { %265 = dma.vmem_to_hbm [thread:$0]  %s263_s24, 128, %s386_s3, [#allocation4]  }
 0x125   :  { %343 = dma.done.wait [#allocation4], 128  }
 0x126   :  { %344 = vsyncadd [#allocation4], 4294967168 }
 0x127   :  { %269 = vsyncpa [#allocation3], 1 }
 0x128   :  { %270 = vsyncpa [#allocation6], 1 }
 0x129   :  { %271 = vsyncpa [#allocation4], 1 }

</bundles_post_ra>
